<compile_context>
chip_gen: v6e
topology: v6e:2x2x1
jax: 0.10.0
libtpu: 0.0.40
codegen_flags: <defaults>
</compile_context>

<pallas_src>
import jax
import jax.numpy as jnp
from jax.experimental import pallas as pl
from jax.experimental.pallas import tpu as pltpu


def _round_up(x, m):
    return ((x + m - 1) // m) * m


def _down_fused_kernel(x_ref, w_ref, b_ref, o_ref):
    # x_ref: (tm, Kp)  f32   packed rows (pack points/row, lane-dense K)
    # w_ref: (Kp, Npk) bf16  block-diagonal fused weight (grid-resident)
    # b_ref: (1, Npk)  f32   fused bias (Linear bias + conv bias + BN fold)
    # o_ref: (tm, Npk) bf16  packed output rows (lane-dense N)
    x = x_ref[...].astype(w_ref.dtype)          # in-kernel cast hides under the DMA
    acc = jnp.dot(x, w_ref[...], preferred_element_type=jnp.float32)
    y = acc + b_ref[...]                        # epilogue stays in f32 (v5e VPU has no bf16)
    o_ref[...] = jnp.maximum(y, 0.0).astype(o_ref.dtype)


def fold_down_params(params, *, eps=1e-5, io_dtype=jnp.bfloat16):
    """One-time (hoisted) fold: Linear -> 1x1 Conv -> eval BN collapse into one
    affine map z = x @ w_fused + b_fused (legal: no nonlinearity in between),
    then packed into a lane-dense block-diagonal form."""
    w1, b1, wc, bc = params["w1"], params["b1"], params["wc"], params["bc"]
    gamma, beta = params["bn_gamma"], params["bn_beta"]
    mean, var = params["bn_mean"], params["bn_var"]
    Cin, Cout = w1.shape[0], wc.shape[1]

    s = gamma / jnp.sqrt(var + eps)                              # (Cout,)
    w_fused = (w1 @ wc) * s[None, :]                             # (Cin, Cout)
    b_fused = (b1 @ wc) * s + (bc - mean) * s + beta             # (Cout,)

    # Lane-dense packing: `pack` consecutive points per matrix row, so the
    # contraction is K = pack*Cin = 128 lanes and N = pack*Cout is a 128-multiple.
    # TODO(synk): when 128 % Cin != 0 or Cin > 128 this falls back to a
    #             lane-sparse (correct but slower) pack=1 path.
    pack = 128 // Cin if (Cin <= 128 and 128 % Cin == 0) else 1
    Kp, Npk = pack * Cin, pack * Cout

    w_packed = jnp.kron(jnp.eye(pack, dtype=jnp.float32), w_fused).astype(io_dtype)
    b_packed = jnp.tile(b_fused, pack).reshape(1, Npk).astype(jnp.float32)
    return dict(w_packed=w_packed, b_packed=b_packed, pack=pack,
                Cin=Cin, Cout=Cout, Kp=Kp, Npk=Npk, io_dtype=io_dtype)


def down_layer_forward(points, folded, *, tm=4096):
    """points: (B, npoint, nsample, Cin) f32 -> (B, npoint, nsample, Cout) io_dtype."""
    B, Npt, Ns, Cin = points.shape
    assert Cin == folded["Cin"]
    pack, Kp, Npk = folded["pack"], folded["Kp"], folded["Npk"]
    Cout, io_dtype = folded["Cout"], folded["io_dtype"]

    M = B * Npt * Ns
    pad_points = (-M) % pack                    # <= pack-1 rows; 0 in the common case
    x = points.reshape(M, Cin)                  # f32; cast happens inside the kernel
    if pad_points:
        x = jnp.pad(x, ((0, pad_points), (0, 0)))
    R = (M + pad_points) // pack
    x = x.reshape(R, Kp)                        # row-major reshape: free

    # Row tile: large (kernel is HBM-bandwidth-bound), forced to a multiple of 16
    # (bf16 output sublane tile); the ragged last block is clipped by Pallas, so
    # no full-tile padding of the input or the output is needed.
    tm_rows = max(16, (min(tm, _round_up(R, 16)) // 16) * 16)
    grid = pl.cdiv(R, tm_rows)
    if grid == 1 and R >= 32:
        # split so both v7x TensorCores get work under dimension_semantics=("parallel",)
        tm_rows = max(16, _round_up(pl.cdiv(R, 2), 16))
        grid = pl.cdiv(R, tm_rows)
    elif 1 < grid <= 8 and grid % 2 == 1:
        # round a small odd grid to an even step count for v7x megacore balance
        tm_rows = max(16, _round_up(pl.cdiv(R, grid + 1), 16))
        grid = pl.cdiv(R, tm_rows)

    # VMEM budget: double-buffered f32 input tile + io_dtype output tile, the
    # resident fused weight/bias, and the f32 dot-result / epilogue temporary,
    # clamped below v7x's 64 MiB physical VMEM (v5e/v6e have 128 MiB physical;
    # their scoped defaults are overridden by this explicit limit).
    io_sz = jnp.dtype(io_dtype).itemsize
    x_bytes = tm_rows * Kp * 4
    o_bytes = tm_rows * Npk * io_sz
    acc_bytes = tm_rows * Npk * 4
    resident = Kp * Npk * io_sz + Npk * 4
    vmem_limit = int(min(max(2 * (x_bytes + o_bytes + resident)
                             + 2 * acc_bytes + (2 << 20),
                             8 << 20), 40 << 20))

    out = pl.pallas_call(
        _down_fused_kernel,
        out_shape=jax.ShapeDtypeStruct((R, Npk), io_dtype),
        grid_spec=pltpu.PrefetchScalarGridSpec(
            num_scalar_prefetch=0,
            grid=(grid,),
            in_specs=[
                pl.BlockSpec((tm_rows, Kp), lambda i: (i, 0)),
                pl.BlockSpec((Kp, Npk), lambda i: (0, 0)),   # resident fused weight
                pl.BlockSpec((1, Npk), lambda i: (0, 0)),    # resident fused bias
            ],
            out_specs=pl.BlockSpec((tm_rows, Npk), lambda i: (i, 0)),
        ),
        compiler_params=pltpu.CompilerParams(
            dimension_semantics=("parallel",),
            vmem_limit_bytes=vmem_limit),
    )(x, folded["w_packed"], folded["b_packed"])

    out = out.reshape(R * pack, Cout)           # row-major unpack: free
    if pad_points:
        out = out[:M]                           # only when a ragged pack pad was added
    return out.reshape(B, Npt, Ns, Cout)


def down_layer_ref(points, params):
    """Pure-JAX f32 reference mirroring Linear -> 1x1 Conv -> eval BN -> ReLU."""
    eps = 1e-5
    h = jnp.einsum("bpsc,cm->bpsm", points, params["w1"]) + params["b1"]
    y = jnp.einsum("bpsm,mo->bpso", h, params["wc"]) + params["bc"]
    y = (y - params["bn_mean"]) / jnp.sqrt(params["bn_var"] + eps)
    y = y * params["bn_gamma"] + params["bn_beta"]
    return jnp.maximum(y, 0.0)


def init_params(key, in_channels, mlp_channels, out_channels):
    ks = jax.random.split(key, 6)
    # nn.Linear(in_channels, mlp_channels): weight (Cmlp, Cin) -> store transposed.
    w1 = jax.random.normal(ks[0], (in_channels, mlp_channels), jnp.float32) * 0.1
    b1 = jax.random.normal(ks[1], (mlp_channels,), jnp.float32) * 0.1
    # nn.Conv2d(mlp_channels, out_channels, 1): weight (Cout, Cmlp, 1, 1) -> (Cmlp, Cout).
    wc = jax.random.normal(ks[2], (mlp_channels, out_channels), jnp.float32) * 0.1
    bc = jax.random.normal(ks[3], (out_channels,), jnp.float32) * 0.1
    # BatchNorm2d(out_channels), eval-mode stats (deterministic, nontrivial).
    bn_gamma = 1.0 + 0.1 * jax.random.normal(ks[4], (out_channels,), jnp.float32)
    bn_beta = 0.1 * jax.random.normal(ks[5], (out_channels,), jnp.float32)
    bn_mean = jnp.zeros((out_channels,), jnp.float32)
    bn_var = jnp.ones((out_channels,), jnp.float32)
    return dict(w1=w1, b1=b1, wc=wc, bc=bc, bn_gamma=bn_gamma, bn_beta=bn_beta,
                bn_mean=bn_mean, bn_var=bn_var)


if __name__ == "__main__":
    # Small shapes consistent with the module.
    B, npoint, nsample = 2, 8, 16
    in_channels, mlp_channels, out_channels = 16, 32, 64

    key = jax.random.PRNGKey(0)
    k_pts, k_xyz, k_t, k_par = jax.random.split(key, 4)

    points = jax.random.normal(k_pts, (B, npoint, nsample, in_channels), jnp.float32)
    xyz = jax.random.normal(k_xyz, (B, npoint, 3), jnp.float32)   # unused by given forward
    t = jax.random.normal(k_t, (B,), jnp.float32)                 # unused by given forward

    params = init_params(k_par, in_channels, mlp_channels, out_channels)

    # Hoisted one-time parameter fold (Linear + 1x1 Conv + eval BN -> one affine).
    folded = fold_down_params(params)
    folded = jax.tree_util.tree_map(
        lambda v: jax.block_until_ready(v) if isinstance(v, jax.Array) else v, folded)

    out = down_layer_forward(points, folded)
    out = jax.block_until_ready(out)

    ref = down_layer_ref(points, params)
    assert out.shape == (B, npoint, nsample, out_channels)
    # bf16 HBM I/O -> compare in f32 with bf16-appropriate tolerance.
    assert jnp.allclose(out.astype(jnp.float32), ref, atol=3e-2, rtol=3e-2)

    print("KERNEL_OK")
</pallas_src>

<mosaic_0001>
module attributes {stable_mosaic.version = 11 : i64} {
  func.func @_down_fused_kernel(%arg0: i32, %arg1: memref<16x128xf32, #tpu.memory_space<vmem>>, %arg2: memref<128x512xbf16, #tpu.memory_space<vmem>>, %arg3: memref<1x512xf32, #tpu.memory_space<vmem>>, %arg4: memref<16x512xbf16, #tpu.memory_space<vmem>>) attributes {dimension_semantics = [#tpu.dimension_semantics<parallel>], iteration_bounds = array<i64: 2>, scalar_prefetch = 0 : i64, scratch_operands = 0 : i64, tpu.core_type = #tpu.core_type<tc>, window_params = [{transform_indices = @transform_0, window_bounds = array<i64: 16, 128>}, {pipeline_mode = #tpu.pipeline_mode<synchronous>, transform_indices = @transform_1, window_bounds = array<i64: 128, 512>}, {pipeline_mode = #tpu.pipeline_mode<synchronous>, transform_indices = @transform_2, window_bounds = array<i64: 1, 512>}, {transform_indices = @transform_3, window_bounds = array<i64: 16, 512>}]} {
    %c0 = arith.constant 0 : index
    %c0_0 = arith.constant 0 : index
    %0 = vector.load %arg1[%c0, %c0_0] : memref<16x128xf32, #tpu.memory_space<vmem>>, vector<16x128xf32>
    %1 = arith.truncf %0 : vector<16x128xf32> to vector<16x128xbf16>
    %c0_1 = arith.constant 0 : index
    %c0_2 = arith.constant 0 : index
    %2 = vector.load %arg2[%c0_1, %c0_2] : memref<128x512xbf16, #tpu.memory_space<vmem>>, vector<128x512xbf16>
    %cst = arith.constant dense<0.000000e+00> : vector<16x512xf32>
    %3 = tpu.matmul %1, %2, %cst {dimension_numbers = #tpu.dot_dimension_numbers<[1], [0], [0], [1], [0, 0, 1, 1], [], []>} : vector<16x128xbf16>, vector<128x512xbf16>, vector<16x512xf32> -> vector<16x512xf32>
    %c0_3 = arith.constant 0 : index
    %c0_4 = arith.constant 0 : index
    %4 = vector.load %arg3[%c0_3, %c0_4] : memref<1x512xf32, #tpu.memory_space<vmem>>, vector<1x512xf32>
    %5 = vector.broadcast %4 : vector<1x512xf32> to vector<16x512xf32>
    %6 = arith.addf %3, %5 : vector<16x512xf32>
    %cst_5 = arith.constant 0.000000e+00 : f32
    %7 = vector.broadcast %cst_5 : f32 to vector<16x512xf32>
    %8 = arith.maximumf %6, %7 : vector<16x512xf32>
    %9 = arith.truncf %8 : vector<16x512xf32> to vector<16x512xbf16>
    %c0_6 = arith.constant 0 : index
    %c0_7 = arith.constant 0 : index
    %10 = vector.load %arg4[%c0_6, %c0_7] : memref<16x512xbf16, #tpu.memory_space<vmem>>, vector<16x512xbf16>
    tpu.vector_store %arg4[%c0_6, %c0_7], %9 {strides = array<i32>} : memref<16x512xbf16, #tpu.memory_space<vmem>>, vector<16x512xbf16>,
    return
  }
  func.func @transform_0(%arg0: i32) -> (i32, i32) {
    %c0_i32 = arith.constant 0 : i32
    %c0_i32_0 = arith.constant 0 : i32
    return %arg0, %c0_i32 : i32, i32
  }
  func.func @transform_1(%arg0: i32) -> (i32, i32) {
    %c0_i32 = arith.constant 0 : i32
    %c0_i32_0 = arith.constant 0 : i32
    %c0_i32_1 = arith.constant 0 : i32
    return %c0_i32, %c0_i32_0 : i32, i32
  }
  func.func @transform_2(%arg0: i32) -> (i32, i32) {
    %c0_i32 = arith.constant 0 : i32
    %c0_i32_0 = arith.constant 0 : i32
    %c0_i32_1 = arith.constant 0 : i32
    return %c0_i32, %c0_i32_0 : i32, i32
  }
  func.func @transform_3(%arg0: i32) -> (i32, i32) {
    %c0_i32 = arith.constant 0 : i32
    %c0_i32_0 = arith.constant 0 : i32
    return %arg0, %c0_i32 : i32, i32
  }
}

</mosaic_0001>

<bundles_post_ra>
// kernel: tpu_custom_call.1
= control target key start
LH: loop header
LB: loop body
LE: loop exit
PB: predicated region body
PF: predicated region fallthrough
CT: control target
= control target key end

     0   :  { %8 = vsyncpa [#allocation3], 0  ;;  %s1223_s0 = inlined_call_operand.hbm [shape: f32[32,128], index: 0, kind: input, shape index: {}]   ;;  %s1224_s1 = inlined_call_operand.hbm [shape: bf16[128,512], index: 1, kind: input, shape index: {}]   ;;  %s1225_s2 = inlined_call_operand.hbm [shape: f32[1,512], index: 2, kind: input, shape index: {}]   ;;  %s1226_s3 = inlined_call_operand.hbm [shape: bf16[32,512], index: 3, kind: output, shape index: {}]  }
   0x1   :  { %10 = vsyncpa [#allocation3 + $0x1], 0 }
   0x2   :  { %11 = vsyncpa [#allocation6], 0 }
   0x3   :  { %12 = vsyncpa [#allocation4], 0 }
   0x4   :  { %14 = vsyncpa [#allocation4 + $0x1], 0  ;;  %s1030_s12 = smov 0   ;;  %s1032_s13 = smov 0  }
   0x5   :  { %s1034_s14 = smov 0   ;;  %s1036_s15 = smov 0  }
   0x6 LB: > { %s1051_s16 = sadd.s32 4294967295, %s997_s15   ;;  %s665_s17 = sadd.s32 4294967294, %s997_s15   ;;  %s997_s15 = sphi %s1036_s15, %s1248_s15   ;;  %s993_s14 = sphi %s1034_s14, %s1247_s14   ;;  %s989_s13 = sphi %s1032_s13, %s1246_s13   ;;  %s985_s12 = sphi %s1030_s12, %s1245_s12  }
   0x7   : > { %p40_p0 = scmp.ne.s32.totalorder %s989_s13, %s985_s12  ;;  %p1227_p1 = scmp.eq.s32.totalorder %s1051_s16, 0 }
   0x8   : > { %p112_p3 = scmp.eq.s32.totalorder %s665_s17, 1  ;;  %p666_p5 = scmp.ge.s32.totalorder %s997_s15, 1 }
   0x9   : > { %p1060_p4 = por %p1227_p1, %p40_p0  ;;  %p119_p7 = scmp.lt.s32.totalorder %s997_s15, 3 }
   0xa   : > { %p1065_p6 = por %p112_p3, %p40_p0  ;;  %s999_s21 = smov [#allocation5]  }
   0xb   : > { %s1231_s18 = scalar_select %p1060_p4, 1, 0 }
   0xc   : > { %s1232_s19 = scalar_select %p1065_p6, 1, 0 }
   0xd   : > { %p1070_p8 = pnand %p666_p5, %p119_p7  ;;  %s131_s22 = sshll.u32 %s999_s21, 4  ;;  %s132_s22 = int_to_ptr.vmem [resolvable:$true] %s131_s22 }
   0xe   : > { %s1000_s24 = smov [#allocation7]   ;;  %s860_s26 = scalar_lea.vmem %s132_s22, 4096 }
   0xf   : > { %s1233_s20 = scalar_select %p1070_p8, 1, 0 }
  0x10   : > { %p739_p9 = pneg %p1070_p8  ;;  %s145_s25 = sshll.u32 %s1000_s24, 4  ;;  %s146_s25 = int_to_ptr.vmem [resolvable:$true] %s145_s25 }
  0x11   : > { %p861_p13 = scmp.ne.s32.totalorder %s132_s22, %s860_s26  ;;  %p868_p5 = scmp.lt.s32.totalorder %s132_s22, %s132_s22 }
  0x12   : > { %p1079_p11 = pnand %p739_p9, %p1227_p1  ;;  %p869_p7 = scmp.lt.s32.totalorder %s860_s26, %s860_s26 }
  0x14   : > { %p851_p12 = pneg %p1079_p11  ;;  %p870_p10 = por %p869_p7, %p868_p5 }
  0x16   : > { %p863_p0 = pnand %p861_p13, %p851_p12 }
  0x18   : > { %p864_p3 = pneg %p863_p0 }
  0x1a   : > { %p871_p9 = pnand %p870_p10, %p864_p3 }
  0x1c   : > { %874 = shalt.err (!%p871_p9)
}
  0x1d   : > { %s1001_s27 = smov 256   ;;  %s1002_s28 = smov 16  }
  0x1e   : > { %742 = dma.hbm_to_vmem [thread:$0]  (!%p1079_p11), %s1224_s1, 4096, %s132_s22, [#allocation6], %s1001_s27, %s1001_s27, %s1002_s28  }
  0x1f   : > { %s886_s4 = scalar_lea.vmem %s146_s25, 64  ;;  %p894_p2 = scmp.lt.s32.totalorder %s146_s25, %s146_s25 }
  0x20   : > { %p887_p1 = scmp.ne.s32.totalorder %s146_s25, %s886_s4  ;;  %p895_p6 = scmp.lt.s32.totalorder %s886_s4, %s886_s4 }
  0x22   : > { %p889_p13 = pnand %p887_p1, %p851_p12  ;;  %p896_p5 = por %p895_p6, %p894_p2 }
  0x24   : > { %p890_p0 = pneg %p889_p13 }
  0x26   : > { %p897_p10 = pnand %p896_p5, %p890_p0 }
  0x28   : > { %900 = shalt.err (!%p897_p10)
}
  0x29   : > { %745 = dma.hbm_to_vmem [thread:$0]  (!%p1079_p11), %s1225_s2, 64, %s146_s25, [#allocation6]  }
  0x2a   : > { %s1102_s7 = sadd.s32 1, %s997_s15   ;;  %s27_s8 = sadd.s32 1, %s993_s14 }
  0x2b   : > { %s24_s9 = ssub.s32 %s997_s15, %s1102_s7  ;;  %p34_p1 = scmp.ne.s32.totalorder %s993_s14, %s989_s13 }
  0x2c   : > { %p25_p2 = scmp.eq.s32.totalorder %s24_s9, 0  ;;  %p35_p6 = scmp.eq.s32.totalorder %s997_s15, 0 }
  0x2d   : > { %p1235_p12 = scmp.eq.s32.totalorder %s1051_s16, 1  ;;  %p756_p7 = scmp.lt.s32.totalorder %s997_s15, 2 }
  0x2e   : > { %s1118_s11 = scalar_select %p25_p2, %s993_s14, %s27_s8  }
  0x2f   : > { %p1112_p3 = por %p1235_p12, %p34_p1  ;;  %p36_p9 = por %p35_p6, %p34_p1 }
  0x30   : > { %s156_s17 = sand.u32 1, %s993_s14   ;;  %s720_s22 = sshll.u32 %s997_s15, 8 }
  0x31   : > { %s1236_s10 = scalar_select %p1112_p3, 1, 0 }
  0x32   : > { %s670_s21 = sshll.u32 %s156_s17, 4  ;;  %s1125_s25 = scalar_lea.hbm %s1223_s0, %s720_s22 }
  0x33   : > { %s160_s26 = scalar_lea.vmem [#allocation2], %s670_s21  ;;  %p1129_p11 = pnand %p756_p7, %p36_p9 }
  0x34   : > { %s167_s27 = sshll.u32 %s160_s26, 4  ;;  %s1133_s29 = scalar_lea.sflag [#allocation3], %s156_s17  ;;  %s1127_s27 = int_to_ptr.vmem [resolvable:$true] %s167_s27 }
  0x35   : > { %s901_s30 = scalar_lea.hbm %s1125_s25, 256  ;;  %p903_p0 = pneg %p1129_p11 }
  0x36   : > { %p902_p13 = scmp.ne.s32.totalorder %s1125_s25, %s901_s30  ;;  %s906_s6 = scalar_lea.hbm %s1223_s0, 512 }
  0x37   : > { %p907_p1 = scmp.lt.s32.totalorder %s1125_s25, %s1223_s0  ;;  %p908_p2 = scmp.lt.s32.totalorder %s906_s6, %s901_s30 }
  0x38   : > { %p904_p5 = pnand %p903_p0, %p902_p13 }
  0x39   : > { %p909_p6 = por %p908_p2, %p907_p1 }
  0x3a   : > { %p905_p10 = pneg %p904_p5 }
  0x3c   : > { %p910_p12 = pnand %p909_p6, %p905_p10 }
  0x3e   : > { %913 = shalt.err (!%p910_p12)
}
  0x3f   : > { %s914_s17 = scalar_lea.vmem %s1127_s27, 256  ;;  %s1003_s21 = smov [#allocation2]  }
  0x40   : > { %p915_p7 = scmp.ne.s32.totalorder %s1127_s27, %s914_s17  ;;  %s919_s22 = sshll.u32 %s1003_s21, 4  ;;  %s920_s22 = int_to_ptr.vmem [resolvable:$false] %s919_s22 }
  0x41   : > { %s921_s23 = scalar_lea.vmem %s920_s22, 512  ;;  %p922_p5 = scmp.lt.s32.totalorder %s1127_s27, %s920_s22 }
  0x42   : > { %p917_p9 = pnand %p915_p7, %p903_p0  ;;  %p923_p3 = scmp.lt.s32.totalorder %s921_s23, %s914_s17 }
  0x44   : > { %p918_p13 = pneg %p917_p9  ;;  %p924_p4 = por %p923_p3, %p922_p5 }
  0x46   : > { %p925_p8 = pnand %p924_p4, %p918_p13 }
  0x48   : > { %928 = shalt.err (!%p925_p8)
}
  0x49   : > { %s1004_s24 = smov 128   ;;  %s1005_s26 = smov 8  }
  0x4a   : > { %749 = dma.hbm_to_vmem [thread:$0]  (!%p1129_p11), %s1125_s25, 256, %s1127_s27, %s1133_s29, %s1004_s24, %s1004_s24, %s1005_s26  }
  0x4b   : > { %p1238_p0 = scmp.ne.s32.totalorder %s1233_s20, 0 }
  0x4c   : > { %s1157_s30 = sand.u32 (!%p1238_p0), 1, %s989_s13   ;;  %p1239_p4 = scmp.ne.s32.totalorder (!%p1238_p0), %s1231_s18, 0 }
  0x4d   : > { %179 = sbr.rel (%p1238_p0) target bundleno = 339 (0x153), region = 32  ;;  %s674_s4 = sshll.u32 (!%p1238_p0), %s1157_s30, 4 }
  0x4e   : > { %s182_s5 = scalar_lea.sflag (!%p1238_p0), [#allocation3], %s1157_s30  ;;  %s1161_s6 = scalar_lea.vmem (!%p1238_p0), [#allocation2], %s674_s4 }
  0x52   : > { %972 = dma.done.wait (%p1239_p4), %s182_s5, 256  }
  0x53   : > { %974 = vsyncadd (%p1239_p4), %s182_s5, 4294967040  ;;  %p1240_p8 = scmp.eq.s32.totalorder %s1051_s16, 0 }
  0x55   : > { %976 = dma.done.wait (%p1240_p8), [#allocation6], 4160   ;;  %p1241_p3 = pmov %p1240_p8 }
  0x56   : > { %v1006_v0 = vmov 0   ;;  %v801_v1 = vld [vmem:[#allocation5 + $0xe4] ss:$16 sps:$4 sm:$0xff]   ;;  %v803_v2 = vld [vmem:[#allocation5 + $0xec] ss:$16 sps:$4 sm:$0xff]   ;;  %v256_v36 = vlaneseq  ;;  %s677_s18 = sshll.u32 %s1157_s30, 5 }
  0x57   : > { %978 = vsyncadd (%p1241_p3), [#allocation6], 4294963136  ;;  %468 = vmatprep.mubr.bf16.mxu0 %v1006_v0  ;;  %511 = vmatprep.mubr.bf16.mxu1 %v1006_v0  ;;  %v805_v3 = vld [vmem:[#allocation5 + $0xe0] ss:$16 sps:$4 sm:$0xff]   ;;  %v806_v4 = vld [vmem:[#allocation5 + $0xe8] ss:$16 sps:$4 sm:$0xff]  }
  0x58   : > { %436 = vmatprep.subr.bf16.mxu0 %v801_v1  ;;  %479 = vmatprep.subr.bf16.mxu1 %v803_v2  ;;  %v807_v5 = vld [vmem:[#allocation5 + $0xc4] ss:$16 sps:$4 sm:$0xff]   ;;  %v809_v6 = vld [vmem:[#allocation5 + $0xcc] ss:$16 sps:$4 sm:$0xff]   ;;  %v811_v7 = vld [vmem:[#allocation5 + $0xc0] ss:$16 sps:$4 sm:$0xff]  }
  0x59   : > { %437 = vmatpush1.bf16.msra.mxu0 %v805_v3  ;;  %480 = vmatpush1.bf16.msra.mxu1 %v806_v4  ;;  %v812_v8 = vld [vmem:[#allocation5 + $0xc8] ss:$16 sps:$4 sm:$0xff]   ;;  %v813_v9 = vld [vmem:[#allocation5 + $0xa4] ss:$16 sps:$4 sm:$0xff]   ;;  %v815_v10 = vld [vmem:[#allocation5 + $0xac] ss:$16 sps:$4 sm:$0xff]  }
  0x5a   : > { %438 = vmatprep.subr.bf16.mxu0 %v807_v5  ;;  %481 = vmatprep.subr.bf16.mxu1 %v809_v6  ;;  %v817_v11 = vld [vmem:[#allocation5 + $0xa0] ss:$16 sps:$4 sm:$0xff]   ;;  %v818_v12 = vld [vmem:[#allocation5 + $0xa8] ss:$16 sps:$4 sm:$0xff]   ;;  %v819_v13 = vld [vmem:[#allocation5 + $0x84] ss:$16 sps:$4 sm:$0xff]  }
  0x5b   : > { %v821_v14 = vld [vmem:[#allocation5 + $0x8c] ss:$16 sps:$4 sm:$0xff]   ;;  %v823_v15 = vld [vmem:[#allocation5 + $0x80] ss:$16 sps:$4 sm:$0xff]   ;;  %v824_v16 = vld [vmem:[#allocation5 + $0x88] ss:$16 sps:$4 sm:$0xff]  }
  0x5c   : > { %v825_v17 = vld [vmem:[#allocation5 + $0x64] ss:$16 sps:$4 sm:$0xff]   ;;  %v827_v18 = vld [vmem:[#allocation5 + $0x6c] ss:$16 sps:$4 sm:$0xff]   ;;  %v829_v19 = vld [vmem:[#allocation5 + $0x60] ss:$16 sps:$4 sm:$0xff]  }
  0x5d   : > { %439 = vmatpush1.bf16.msra.mxu0 %v811_v7  ;;  %482 = vmatpush1.bf16.msra.mxu1 %v812_v8  ;;  %v830_v20 = vld [vmem:[#allocation5 + $0x68] ss:$16 sps:$4 sm:$0xff]   ;;  %v831_v21 = vld [vmem:[#allocation5 + $0x44] ss:$16 sps:$4 sm:$0xff]   ;;  %v833_v22 = vld [vmem:[#allocation5 + $0x4c] ss:$16 sps:$4 sm:$0xff]  }
  0x5e   : > { %440 = vmatprep.subr.bf16.mxu0 %v813_v9  ;;  %483 = vmatprep.subr.bf16.mxu1 %v815_v10  ;;  %v835_v23 = vld [vmem:[#allocation5 + $0x40] ss:$16 sps:$4 sm:$0xff]   ;;  %v836_v24 = vld [vmem:[#allocation5 + $0x48] ss:$16 sps:$4 sm:$0xff]   ;;  %v837_v25 = vld [vmem:[#allocation5 + $0x24] ss:$16 sps:$4 sm:$0xff]  }
  0x5f   : > { %v839_v26 = vld [vmem:[#allocation5 + $0x2c] ss:$16 sps:$4 sm:$0xff]   ;;  %v841_v27 = vld [vmem:[#allocation5 + $0x20] ss:$16 sps:$4 sm:$0xff]   ;;  %v842_v28 = vld [vmem:[#allocation5 + $0x28] ss:$16 sps:$4 sm:$0xff]  }
  0x60   : > { %v843_v29 = vld [vmem:[#allocation5 + $0x4] ss:$16 sps:$4 sm:$0xff]   ;;  %v845_v30 = vld [vmem:[#allocation5 + $0xc] ss:$16 sps:$4 sm:$0xff]   ;;  %v847_v31 = vld [vmem:[#allocation5] ss:$16 sps:$4 sm:$0xff]  }
  0x61   : > { %441 = vmatpush1.bf16.msra.mxu0 %v817_v11  ;;  %484 = vmatpush1.bf16.msra.mxu1 %v818_v12  ;;  %v848_v32 = vld [vmem:[#allocation5 + $0x8] ss:$16 sps:$4 sm:$0xff]   ;;  %v219_v33 = vld [vmem:[%s1161_s6] sm:$0xff]  ;;  %v257_v37 = vshrl.u32 %v256_v36, 7  ;;  %s215_s20 = scalar_lea.vmem [#allocation8], %s677_s18  ;;  %s726_s27 = sshll.u32 %s1051_s16, 9 }
  0x62   : > { %442 = vmatprep.subr.bf16.mxu0 %v819_v13  ;;  %485 = vmatprep.subr.bf16.mxu1 %v821_v14  ;;  %v220_v34 = vld [vmem:[%s1161_s6 + $0x8] sm:$0xff]  ;;  %v254_v40 = vld [vmem:[#allocation7] sm:$0xf]  ;;  %s573_s25 = sshll.u32 %s215_s20, 4  ;;  %s1180_s8 = scalar_lea.hbm %s1226_s3, %s726_s27  ;;  %s1175_s25 = int_to_ptr.vmem [resolvable:$true] %s573_s25 }
  0x63   : > { %v221_v35 = vpack.c.bf16 %v220_v34, %v219_v33  ;;  %v258_v38 = vsub.s32 0, %v257_v37  ;;  %v266_v39 = vsub.s32 2, %v257_v37  ;;  %v262_v41 = vsub.s32 1, %v257_v37  ;;  %s559_s16 = scalar_lea.sflag [#allocation4], %s1157_s30  ;;  %s929_s9 = scalar_lea.vmem %s1175_s25, 512 }
  0x64   : > { %v270_v42 = vsub.s32 3, %v257_v37  ;;  %p930_p11 = scmp.ne.s32.totalorder %s1175_s25, %s929_s9  ;;  %p1242_p10 = scmp.ne.s32.totalorder %s1236_s10, 0 }
  0x65   : > { %443 = vmatpush1.bf16.msra.mxu0 %v823_v15  ;;  %486 = vmatpush1.bf16.msra.mxu1 %v824_v16  ;;  %v259_v43 = vrot.slane %v254_v40, %v258_v38  ;;  %v267_v44 = vrot.slane %v254_v40, %v266_v39  ;;  %v263_v45 = vrot.slane %v254_v40, %v262_v41  ;;  %s1007_s17 = smov [#allocation8]  }
  0x66   : > { %444 = vmatprep.subr.bf16.mxu0 %v825_v17  ;;  %487 = vmatprep.subr.bf16.mxu1 %v827_v18  ;;  %v271_v46 = vrot.slane %v254_v40, %v270_v42  ;;  %p931_p1 = pnand %p930_p11, %p1242_p10  ;;  %s933_s21 = sshll.u32 %s1007_s17, 4  ;;  %s934_s21 = int_to_ptr.vmem [resolvable:$false] %s933_s21 }
  0x67   : > { %s935_s22 = scalar_lea.vmem %s934_s21, 1024  ;;  %p936_p6 = scmp.lt.s32.totalorder %s1175_s25, %s934_s21 }
  0x68   : > { %p932_p2 = pneg %p931_p1  ;;  %p937_p12 = scmp.lt.s32.totalorder %s935_s22, %s929_s9 }
  0x69   : > { %445 = vmatpush1.bf16.msra.mxu0 %v829_v19  ;;  %488 = vmatpush1.bf16.msra.mxu1 %v830_v20 }
  0x6a   : > { %446 = vmatprep.subr.bf16.mxu0 %v831_v21  ;;  %489 = vmatprep.subr.bf16.mxu1 %v833_v22  ;;  %p938_p7 = por %p937_p12, %p936_p6 }
  0x6c   : > { %p939_p9 = pnand %p938_p7, %p932_p2 }
  0x6d   : > { %447 = vmatpush1.bf16.msra.mxu0 %v835_v23  ;;  %490 = vmatpush1.bf16.msra.mxu1 %v836_v24 }
  0x6e   : > { %448 = vmatprep.subr.bf16.mxu0 %v837_v25  ;;  %491 = vmatprep.subr.bf16.mxu1 %v839_v26 }
  0x71   : > { %449 = vmatpush1.bf16.msra.mxu0 %v841_v27  ;;  %492 = vmatpush1.bf16.msra.mxu1 %v842_v28 }
  0x72   : > { %450 = vmatprep.subr.bf16.mxu0 %v843_v29  ;;  %493 = vmatprep.subr.bf16.mxu1 %v845_v30 }
  0x75   : > { %451 = vmatpush1.bf16.msra.mxu0 %v847_v31  ;;  %494 = vmatpush1.bf16.msra.mxu1 %v848_v32 }
  0x78   : > { %469 = vmatmul.mubr.bf16.vlgmr.msra.gmra.mxu0 %v221_v35  ;;  %512 = vmatmul.mubr.bf16.vlgmr.msra.gmra.mxu1 %v221_v35 }
 0x138   : > { %v470_v47 = vpop.f32.mrf.mxu0  ;;  %v513_v48 = vpop.f32.mrf.mxu1 }
 0x139   : > { %v471_v49 = vadd.f32 %v470_v47, %v259_v43  ;;  %v514_v50 = vadd.f32 %v513_v48, %v267_v44 }
 0x13a   : > { %v472_v51 = vpop.f32.mrf.mxu0  ;;  %v515_v52 = vpop.f32.mrf.mxu1 }
 0x13b   : > { %v473_v53 = vadd.f32 %v472_v51, %v263_v45  ;;  %v516_v54 = vadd.f32 %v515_v52, %v271_v46  ;;  %v522_v57 = vmax.f32 %v471_v49, 0.0  ;;  %v524_v58 = vmax.f32 %v514_v50, 0.0 }
 0x13c   : > { %v474_v55 = vpop.f32.mrf.mxu0  ;;  %v517_v56 = vpop.f32.mrf.mxu1 }
 0x13d   : > { %v523_v59 = vmax.f32 %v473_v53, 0.0  ;;  %v525_v60 = vmax.f32 %v516_v54, 0.0  ;;  %v475_v61 = vadd.f32 %v474_v55, %v259_v43  ;;  %v518_v62 = vadd.f32 %v517_v56, %v267_v44 }
 0x13e   : > { %v476_v63 = vpop.f32.mrf.mxu0  ;;  %v519_v0 = vpop.f32.mrf.mxu1 }
 0x13f   : > { %v721_v1 = vpack.c.bf16 %v523_v59, %v522_v57  ;;  %v722_v2 = vpack.c.bf16 %v525_v60, %v524_v58  ;;  %v477_v3 = vadd.f32 %v476_v63, %v263_v45  ;;  %v520_v4 = vadd.f32 %v519_v0, %v271_v46 }
 0x140   : > { %v526_v5 = vmax.f32 %v475_v61, 0.0  ;;  %v528_v6 = vmax.f32 %v518_v62, 0.0 }
 0x141   : > { %554 = vst [vmem:[%s215_s20] sm:$0xff] %v721_v1  ;;  %555 = vst [vmem:[%s215_s20 + $0x8] sm:$0xff] %v722_v2  ;;  %v527_v7 = vmax.f32 %v477_v3, 0.0  ;;  %v529_v8 = vmax.f32 %v520_v4, 0.0 }
 0x143   : > { %v723_v9 = vpack.c.bf16 %v527_v7, %v526_v5  ;;  %v724_v10 = vpack.c.bf16 %v529_v8, %v528_v6 }
 0x145   : > { %556 = vst [vmem:[%s215_s20 + $0x10] sm:$0xff] %v723_v9  ;;  %557 = vst [vmem:[%s215_s20 + $0x18] sm:$0xff] %v724_v10 }
 0x146   : > { %942 = shalt.err (!%p939_p9)
}
 0x147   : > { %s943_s23 = scalar_lea.hbm %s1180_s8, 512  ;;  %s947_s4 = scalar_lea.hbm %s1226_s3, 1024 }
 0x148   : > { %p944_p13 = scmp.ne.s32.totalorder %s1180_s8, %s943_s23  ;;  %p948_p4 = scmp.lt.s32.totalorder %s1180_s8, %s1226_s3 }
 0x149   : > { %p949_p8 = scmp.lt.s32.totalorder %s947_s4, %s943_s23 }
 0x14a   : > { %p945_p5 = pnand %p944_p13, %p1242_p10 }
 0x14b   : > { %p950_p3 = por %p949_p8, %p948_p4 }
 0x14c   : > { %p946_p0 = pneg %p945_p5 }
 0x14e   : > { %p951_p11 = pnand %p950_p3, %p946_p0 }
 0x150   : > { %954 = shalt.err (!%p951_p11)
}
 0x151   : > { %s1008_s18 = smov 256   ;;  %s1009_s20 = smov 16  }
 0x152   : > { %737 = dma.vmem_to_hbm [thread:$0]  (%p1242_p10), %s1175_s25, 512, %s1180_s8, %s559_s16, %s1008_s18, %s1008_s18, %s1009_s20  }
 0x153 PF: > { %s588_s27 = sand.u32 1, %s985_s12   ;;  %p1243_p1 = scmp.ne.s32.totalorder %s1232_s19, 0 }
 0x154   : > { %p1244_p2 = scmp.ge.s32.totalorder %s997_s15, 2  ;;  %s589_s28 = scalar_lea.sflag [#allocation4], %s588_s27 }
 0x156   : > { %p751_p6 = pnand %p1244_p2, %p1243_p1 }
 0x158   : > { %p752_p12 = pneg %p751_p6 }
 0x15a   : > { %980 = dma.done.wait (%p752_p12), %s589_s28, 512  }
 0x15b   : > { %982 = vsyncadd (%p752_p12), %s589_s28, 4294966784  ;;  %p17_p7 = scmp.ge.s32.totalorder %s1102_s7, 4   ;;  %s1245_s12 = smov %s989_s13 }
 0x15c   : > { %s1246_s13 = smov %s993_s14  ;;  %s1247_s14 = smov %s1118_s11 }
 0x15d   : > { %s1248_s15 = smov %s1102_s7  ;;  %19 = sbr.rel (!%p17_p7) target bundleno = 6 (0x6), region = 85 }
 0x162   :  { %594 = vsyncpa [#allocation3], 1 }
 0x163   :  { %596 = vsyncpa [#allocation3 + $0x1], 1 }
 0x164   :  { %597 = vsyncpa [#allocation6], 1 }
 0x165   :  { %598 = vsyncpa [#allocation4], 1 }
 0x166   :  { %600 = vsyncpa [#allocation4 + $0x1], 1 }

</bundles_post_ra>
